<compile_context>
chip_gen: v6e
topology: v6e:2x2x1
jax: 0.10.0
libtpu: 0.0.40
codegen_flags: <defaults>
</compile_context>

<pallas_src>
import jax
import jax.numpy as jnp
from jax.experimental import pallas as pl
from jax.experimental.pallas import tpu as pltpu


_NEG_SLOPE = 0.01  # nn.LeakyReLU() default negative_slope
_MAX_TB = 65536    # hard cap on batch tile (keeps VMEM < ~48 MiB on v7x)


def _leaky_relu(x):
    # max(x, 0.01*x) == where(x > 0, x, 0.01*x); 2 VPU ops instead of 3.
    return jnp.maximum(x, _NEG_SLOPE * x)


def _round_up(x, m):
    return ((x + m - 1) // m) * m


def _make_kernel(precision):
    def net_kernel(x_ref,
                   w1_ref, b1_ref,
                   w2_ref, b2_ref,
                   w3_ref, b3_ref,
                   w4_ref, b4_ref,
                   w5_ref, b5_ref,
                   o_ref):
        # x_ref: [in_dim, TB]; w*: [out, in]; b*: [out, 1]; o_ref: [out_dim, TB]
        compute_dtype = x_ref.dtype  # keep operands in storage dtype (no f32 up-cast)

        def layer(w_ref, b_ref, h, act):
            z = jnp.dot(w_ref[...], h,
                        preferred_element_type=jnp.float32,
                        precision=precision) + b_ref[...]
            if act:
                return _leaky_relu(z).astype(compute_dtype)
            return z  # final layer: keep f32 accumulator

        h = x_ref[...]
        h = layer(w1_ref, b1_ref, h, act=True)
        h = layer(w2_ref, b2_ref, h, act=True)
        h = layer(w3_ref, b3_ref, h, act=True)
        h = layer(w4_ref, b4_ref, h, act=True)
        z = layer(w5_ref, b5_ref, h, act=False)
        o_ref[...] = z.astype(o_ref.dtype)

    return net_kernel


def net_forward(x, params, *,
                block_b=32768,
                input_dtype=None,
                output_dtype=jnp.float32,
                feature_major_in=False,
                feature_major_out=False,
                precision=jax.lax.Precision.HIGHEST):
    """Forward pass of the 5-layer MLP.

    x:                 [B, input_size] (or [input_size, B] if feature_major_in).
    params:            list of 5 (W [out, in], b [out] or [out, 1]) pairs.
    block_b:           target batch-tile size in lanes (rounded to 128,
                       capped at 65536; sweep 32768-65536 for large batches).
    input_dtype:       storage/operand dtype for x and W (e.g. jnp.bfloat16 to
                       halve input-path HBM traffic on all generations).
    output_dtype:      storage dtype of the result (bf16 halves output traffic).
    feature_major_*:   skip the wrapper / consumer transposes entirely.
    precision:         MXU precision for the dots (HIGHEST = exact f32 matmul).
    Returns [B, output_size] (or [output_size, B] if feature_major_out).
    """
    if feature_major_in:
        in_dim, B = x.shape
        x_t = x
    else:
        B, in_dim = x.shape
        x_t = x.T  # single layout op; the cast below fuses into the same fusion

    out_dim = params[-1][0].shape[0]
    output_dtype = jnp.dtype(output_dtype)

    if B == 0:
        res = jnp.zeros((out_dim, 0), output_dtype)
        return res if feature_major_out else res.T

    store_dt = jnp.dtype(input_dtype) if input_dtype is not None else jnp.dtype(x_t.dtype)
    if x_t.dtype != store_dt:
        x_t = x_t.astype(store_dt)

    # ---- batch tile sizing ------------------------------------------------
    b_lanes = _round_up(B, 128)
    tb = min(_round_up(block_b, 128), b_lanes, _MAX_TB)
    # If a single tile would cover the batch but the batch is large, split it
    # so both v7x TensorCores get work under dimension_semantics=("parallel",).
    if pl.cdiv(b_lanes, tb) == 1 and b_lanes >= 1024:
        tb = _round_up(pl.cdiv(b_lanes, 2), 128)
    n_tiles = pl.cdiv(B, tb)   # ragged last tile handled by Pallas masking

    # ---- parameters: W in operand dtype, biases in f32 --------------------
    flat = []
    for w, b in params:
        flat.append(jnp.asarray(w, store_dt))
        flat.append(jnp.asarray(b, jnp.float32).reshape(-1, 1))

    # x / out move with the batch-tile grid index; weights/biases use constant
    # index maps so they stay resident in VMEM across the whole grid.
    x_spec = pl.BlockSpec((in_dim, tb), lambda i: (0, i))
    wb_specs = [pl.BlockSpec(a.shape, lambda i: (0, 0)) for a in flat]
    out_spec = pl.BlockSpec((out_dim, tb), lambda i: (0, i))

    # ---- cost + VMEM budget (double-buffered x/out + f32 temporaries) -----
    param_bytes = sum(int(a.size) * a.dtype.itemsize for a in flat)
    flops = 2 * B * sum(int(w.shape[0]) * int(w.shape[1]) for w, _ in params)
    bytes_accessed = (B * in_dim * store_dt.itemsize
                      + B * out_dim * output_dtype.itemsize
                      + param_bytes)
    widest = max(int(w.shape[0]) for w, _ in params)  # widest hidden layer (16)
    vmem_est = (2 * in_dim * tb * store_dt.itemsize
                + 2 * out_dim * tb * output_dtype.itemsize
                + 4 * widest * tb * 4
                + param_bytes)
    vmem_limit = int(min(48 * 1024 * 1024,
                         max(32 * 1024 * 1024, vmem_est * 3 // 2)))

    out_t = pl.pallas_call(
        _make_kernel(precision),
        out_shape=jax.ShapeDtypeStruct((out_dim, B), output_dtype),
        grid=(n_tiles,),
        in_specs=[x_spec] + wb_specs,
        out_specs=out_spec,
        compiler_params=pltpu.CompilerParams(
            dimension_semantics=("parallel",),
            vmem_limit_bytes=vmem_limit),
        cost_estimate=pl.CostEstimate(
            flops=int(flops), transcendentals=0,
            bytes_accessed=int(bytes_accessed)),
    )(x_t, *flat)

    if feature_major_out:
        return out_t            # [out_dim, B]
    return out_t.T              # [B, out_dim]


def init_params(key, input_size, output_size):
    """nn.Linear-style init: W [out, in], b [out, 1], U(-1/sqrt(in), 1/sqrt(in))."""
    sizes = [(input_size, 8), (8, 16), (16, 8), (8, 4), (4, output_size)]
    params = []
    for fan_in, fan_out in sizes:
        key, kw, kb = jax.random.split(key, 3)
        bound = 1.0 / jnp.sqrt(jnp.float32(fan_in))
        w = jax.random.uniform(kw, (fan_out, fan_in), jnp.float32, -bound, bound)
        b = jax.random.uniform(kb, (fan_out, 1), jnp.float32, -bound, bound)
        params.append((w, b))
    return params


def reference_forward(x, params):
    h = x
    for i, (w, b) in enumerate(params):
        h = jnp.dot(h, w.T, precision=jax.lax.Precision.HIGHEST) + b[:, 0]
        if i < len(params) - 1:
            h = _leaky_relu(h)
    return h


if __name__ == "__main__":
    input_size = 8
    output_size = 4
    batch = 2

    key = jax.random.PRNGKey(0)
    key, kx = jax.random.split(key)
    x = jax.random.normal(kx, (batch, input_size), jnp.float32)
    params = init_params(key, input_size, output_size)

    ref = reference_forward(x, params)

    # Default f32 path (exact-precision dots on both sides).
    out = jax.block_until_ready(net_forward(x, params))
    assert out.shape == (batch, output_size)
    assert jnp.allclose(out, ref, atol=1e-4, rtol=1e-4)

    # bf16 storage for x/W and bf16 output (HBM-traffic win); f32 accumulation.
    out_bf16 = jax.block_until_ready(
        net_forward(x, params, input_dtype=jnp.bfloat16,
                    output_dtype=jnp.bfloat16))
    assert jnp.allclose(out_bf16.astype(jnp.float32), ref, atol=5e-2, rtol=5e-2)

    # Feature-major in/out: no wrapper-side transposes at all.
    out_fm = jax.block_until_ready(
        net_forward(x.T, params, feature_major_in=True, feature_major_out=True))
    assert out_fm.shape == (output_size, batch)
    assert jnp.allclose(out_fm.T, ref, atol=1e-4, rtol=1e-4)

    # Larger batch: multiple grid tiles + ragged (masked) final tile, no pad.
    key, kx2 = jax.random.split(key)
    x_big = jax.random.normal(kx2, (300, input_size), jnp.float32)
    ref_big = reference_forward(x_big, params)
    out_big = jax.block_until_ready(net_forward(x_big, params, block_b=128))
    assert out_big.shape == (300, output_size)
    assert jnp.allclose(out_big, ref_big, atol=1e-4, rtol=1e-4)

    # Same large batch at the default (large) tile size: single masked tile.
    out_big2 = jax.block_until_ready(net_forward(x_big, params))
    assert jnp.allclose(out_big2, ref_big, atol=1e-4, rtol=1e-4)

    print("KERNEL_OK")
</pallas_src>

<mosaic_0001>
module attributes {stable_mosaic.version = 11 : i64} {
  func.func @net_kernel(%arg0: i32, %arg1: memref<8x128xf32, #tpu.memory_space<vmem>>, %arg2: memref<8x8xf32, #tpu.memory_space<vmem>>, %arg3: memref<8x1xf32, #tpu.memory_space<vmem>>, %arg4: memref<16x8xf32, #tpu.memory_space<vmem>>, %arg5: memref<16x1xf32, #tpu.memory_space<vmem>>, %arg6: memref<8x16xf32, #tpu.memory_space<vmem>>, %arg7: memref<8x1xf32, #tpu.memory_space<vmem>>, %arg8: memref<4x8xf32, #tpu.memory_space<vmem>>, %arg9: memref<4x1xf32, #tpu.memory_space<vmem>>, %arg10: memref<4x4xf32, #tpu.memory_space<vmem>>, %arg11: memref<4x1xf32, #tpu.memory_space<vmem>>, %arg12: memref<4x128xf32, #tpu.memory_space<vmem>>) attributes {dimension_semantics = [#tpu.dimension_semantics<parallel>], iteration_bounds = array<i64: 1>, scalar_prefetch = 0 : i64, scratch_operands = 0 : i64, tpu.core_type = #tpu.core_type<tc>, window_params = [{transform_indices = @transform_0, window_bounds = array<i64: 8, 128>}, {pipeline_mode = #tpu.pipeline_mode<synchronous>, transform_indices = @transform_1, window_bounds = array<i64: 8, 8>}, {pipeline_mode = #tpu.pipeline_mode<synchronous>, transform_indices = @transform_2, window_bounds = array<i64: 8, 1>}, {pipeline_mode = #tpu.pipeline_mode<synchronous>, transform_indices = @transform_3, window_bounds = array<i64: 16, 8>}, {pipeline_mode = #tpu.pipeline_mode<synchronous>, transform_indices = @transform_4, window_bounds = array<i64: 16, 1>}, {pipeline_mode = #tpu.pipeline_mode<synchronous>, transform_indices = @transform_5, window_bounds = array<i64: 8, 16>}, {pipeline_mode = #tpu.pipeline_mode<synchronous>, transform_indices = @transform_6, window_bounds = array<i64: 8, 1>}, {pipeline_mode = #tpu.pipeline_mode<synchronous>, transform_indices = @transform_7, window_bounds = array<i64: 4, 8>}, {pipeline_mode = #tpu.pipeline_mode<synchronous>, transform_indices = @transform_8, window_bounds = array<i64: 4, 1>}, {pipeline_mode = #tpu.pipeline_mode<synchronous>, transform_indices = @transform_9, window_bounds = array<i64: 4, 4>}, {pipeline_mode = #tpu.pipeline_mode<synchronous>, transform_indices = @transform_10, window_bounds = array<i64: 4, 1>}, {transform_indices = @transform_11, window_bounds = array<i64: 4, 128>}]} {
    %c0 = arith.constant 0 : index
    %c0_0 = arith.constant 0 : index
    %0 = vector.load %arg1[%c0, %c0_0] : memref<8x128xf32, #tpu.memory_space<vmem>>, vector<8x128xf32>
    %c0_1 = arith.constant 0 : index
    %c0_2 = arith.constant 0 : index
    %1 = vector.load %arg2[%c0_1, %c0_2] : memref<8x8xf32, #tpu.memory_space<vmem>>, vector<8x8xf32>
    %cst = arith.constant dense<0.000000e+00> : vector<8x128xf32>
    %2 = tpu.matmul %1, %0, %cst {dimension_numbers = #tpu.dot_dimension_numbers<[1], [0], [0], [1], [0, 0, 1, 1], [], []>, precision = #tpu.contract_precision<fp32>} : vector<8x8xf32>, vector<8x128xf32>, vector<8x128xf32> -> vector<8x128xf32>
    %c0_3 = arith.constant 0 : index
    %c0_4 = arith.constant 0 : index
    %3 = vector.load %arg3[%c0_3, %c0_4] : memref<8x1xf32, #tpu.memory_space<vmem>>, vector<8x1xf32>
    %4 = vector.broadcast %3 : vector<8x1xf32> to vector<8x128xf32>
    %5 = arith.addf %2, %4 : vector<8x128xf32>
    %cst_5 = arith.constant 0.00999999977 : f32
    %6 = vector.broadcast %cst_5 : f32 to vector<8x128xf32>
    %7 = arith.mulf %6, %5 : vector<8x128xf32>
    %8 = arith.maximumf %5, %7 : vector<8x128xf32>
    %c0_6 = arith.constant 0 : index
    %c0_7 = arith.constant 0 : index
    %9 = vector.load %arg4[%c0_6, %c0_7] : memref<16x8xf32, #tpu.memory_space<vmem>>, vector<16x8xf32>
    %cst_8 = arith.constant dense<0.000000e+00> : vector<16x128xf32>
    %10 = tpu.matmul %9, %8, %cst_8 {dimension_numbers = #tpu.dot_dimension_numbers<[1], [0], [0], [1], [0, 0, 1, 1], [], []>, precision = #tpu.contract_precision<fp32>} : vector<16x8xf32>, vector<8x128xf32>, vector<16x128xf32> -> vector<16x128xf32>
    %c0_9 = arith.constant 0 : index
    %c0_10 = arith.constant 0 : index
    %11 = vector.load %arg5[%c0_9, %c0_10] : memref<16x1xf32, #tpu.memory_space<vmem>>, vector<16x1xf32>
    %12 = vector.broadcast %11 : vector<16x1xf32> to vector<16x128xf32>
    %13 = arith.addf %10, %12 : vector<16x128xf32>
    %cst_11 = arith.constant 0.00999999977 : f32
    %14 = vector.broadcast %cst_11 : f32 to vector<16x128xf32>
    %15 = arith.mulf %14, %13 : vector<16x128xf32>
    %16 = arith.maximumf %13, %15 : vector<16x128xf32>
    %c0_12 = arith.constant 0 : index
    %c0_13 = arith.constant 0 : index
    %17 = vector.load %arg6[%c0_12, %c0_13] : memref<8x16xf32, #tpu.memory_space<vmem>>, vector<8x16xf32>
    %cst_14 = arith.constant dense<0.000000e+00> : vector<8x128xf32>
    %18 = tpu.matmul %17, %16, %cst_14 {dimension_numbers = #tpu.dot_dimension_numbers<[1], [0], [0], [1], [0, 0, 1, 1], [], []>, precision = #tpu.contract_precision<fp32>} : vector<8x16xf32>, vector<16x128xf32>, vector<8x128xf32> -> vector<8x128xf32>
    %c0_15 = arith.constant 0 : index
    %c0_16 = arith.constant 0 : index
    %19 = vector.load %arg7[%c0_15, %c0_16] : memref<8x1xf32, #tpu.memory_space<vmem>>, vector<8x1xf32>
    %20 = vector.broadcast %19 : vector<8x1xf32> to vector<8x128xf32>
    %21 = arith.addf %18, %20 : vector<8x128xf32>
    %cst_17 = arith.constant 0.00999999977 : f32
    %22 = vector.broadcast %cst_17 : f32 to vector<8x128xf32>
    %23 = arith.mulf %22, %21 : vector<8x128xf32>
    %24 = arith.maximumf %21, %23 : vector<8x128xf32>
    %c0_18 = arith.constant 0 : index
    %c0_19 = arith.constant 0 : index
    %25 = vector.load %arg8[%c0_18, %c0_19] : memref<4x8xf32, #tpu.memory_space<vmem>>, vector<4x8xf32>
    %cst_20 = arith.constant dense<0.000000e+00> : vector<4x128xf32>
    %26 = tpu.matmul %25, %24, %cst_20 {dimension_numbers = #tpu.dot_dimension_numbers<[1], [0], [0], [1], [0, 0, 1, 1], [], []>, precision = #tpu.contract_precision<fp32>} : vector<4x8xf32>, vector<8x128xf32>, vector<4x128xf32> -> vector<4x128xf32>
    %c0_21 = arith.constant 0 : index
    %c0_22 = arith.constant 0 : index
    %27 = vector.load %arg9[%c0_21, %c0_22] : memref<4x1xf32, #tpu.memory_space<vmem>>, vector<4x1xf32>
    %28 = vector.broadcast %27 : vector<4x1xf32> to vector<4x128xf32>
    %29 = arith.addf %26, %28 : vector<4x128xf32>
    %cst_23 = arith.constant 0.00999999977 : f32
    %30 = vector.broadcast %cst_23 : f32 to vector<4x128xf32>
    %31 = arith.mulf %30, %29 : vector<4x128xf32>
    %32 = arith.maximumf %29, %31 : vector<4x128xf32>
    %c0_24 = arith.constant 0 : index
    %c0_25 = arith.constant 0 : index
    %33 = vector.load %arg10[%c0_24, %c0_25] : memref<4x4xf32, #tpu.memory_space<vmem>>, vector<4x4xf32>
    %cst_26 = arith.constant dense<0.000000e+00> : vector<4x128xf32>
    %34 = tpu.matmul %33, %32, %cst_26 {dimension_numbers = #tpu.dot_dimension_numbers<[1], [0], [0], [1], [0, 0, 1, 1], [], []>, precision = #tpu.contract_precision<fp32>} : vector<4x4xf32>, vector<4x128xf32>, vector<4x128xf32> -> vector<4x128xf32>
    %c0_27 = arith.constant 0 : index
    %c0_28 = arith.constant 0 : index
    %35 = vector.load %arg11[%c0_27, %c0_28] : memref<4x1xf32, #tpu.memory_space<vmem>>, vector<4x1xf32>
    %36 = vector.broadcast %35 : vector<4x1xf32> to vector<4x128xf32>
    %37 = arith.addf %34, %36 : vector<4x128xf32>
    %c0_29 = arith.constant 0 : index
    %c0_30 = arith.constant 0 : index
    %38 = vector.load %arg12[%c0_29, %c0_30] : memref<4x128xf32, #tpu.memory_space<vmem>>, vector<4x128xf32>
    tpu.vector_store %arg12[%c0_29, %c0_30], %37 {strides = array<i32>} : memref<4x128xf32, #tpu.memory_space<vmem>>, vector<4x128xf32>,
    return
  }
  func.func @transform_0(%arg0: i32) -> (i32, i32) {
    %c0_i32 = arith.constant 0 : i32
    %c0_i32_0 = arith.constant 0 : i32
    return %c0_i32, %arg0 : i32, i32
  }
  func.func @transform_1(%arg0: i32) -> (i32, i32) {
    %c0_i32 = arith.constant 0 : i32
    %c0_i32_0 = arith.constant 0 : i32
    %c0_i32_1 = arith.constant 0 : i32
    return %c0_i32, %c0_i32_0 : i32, i32
  }
  func.func @transform_2(%arg0: i32) -> (i32, i32) {
    %c0_i32 = arith.constant 0 : i32
    %c0_i32_0 = arith.constant 0 : i32
    %c0_i32_1 = arith.constant 0 : i32
    return %c0_i32, %c0_i32_0 : i32, i32
  }
  func.func @transform_3(%arg0: i32) -> (i32, i32) {
    %c0_i32 = arith.constant 0 : i32
    %c0_i32_0 = arith.constant 0 : i32
    %c0_i32_1 = arith.constant 0 : i32
    return %c0_i32, %c0_i32_0 : i32, i32
  }
  func.func @transform_4(%arg0: i32) -> (i32, i32) {
    %c0_i32 = arith.constant 0 : i32
    %c0_i32_0 = arith.constant 0 : i32
    %c0_i32_1 = arith.constant 0 : i32
    return %c0_i32, %c0_i32_0 : i32, i32
  }
  func.func @transform_5(%arg0: i32) -> (i32, i32) {
    %c0_i32 = arith.constant 0 : i32
    %c0_i32_0 = arith.constant 0 : i32
    %c0_i32_1 = arith.constant 0 : i32
    return %c0_i32, %c0_i32_0 : i32, i32
  }
  func.func @transform_6(%arg0: i32) -> (i32, i32) {
    %c0_i32 = arith.constant 0 : i32
    %c0_i32_0 = arith.constant 0 : i32
    %c0_i32_1 = arith.constant 0 : i32
    return %c0_i32, %c0_i32_0 : i32, i32
  }
  func.func @transform_7(%arg0: i32) -> (i32, i32) {
    %c0_i32 = arith.constant 0 : i32
    %c0_i32_0 = arith.constant 0 : i32
    %c0_i32_1 = arith.constant 0 : i32
    return %c0_i32, %c0_i32_0 : i32, i32
  }
  func.func @transform_8(%arg0: i32) -> (i32, i32) {
    %c0_i32 = arith.constant 0 : i32
    %c0_i32_0 = arith.constant 0 : i32
    %c0_i32_1 = arith.constant 0 : i32
    return %c0_i32, %c0_i32_0 : i32, i32
  }
  func.func @transform_9(%arg0: i32) -> (i32, i32) {
    %c0_i32 = arith.constant 0 : i32
    %c0_i32_0 = arith.constant 0 : i32
    %c0_i32_1 = arith.constant 0 : i32
    return %c0_i32, %c0_i32_0 : i32, i32
  }
  func.func @transform_10(%arg0: i32) -> (i32, i32) {
    %c0_i32 = arith.constant 0 : i32
    %c0_i32_0 = arith.constant 0 : i32
    %c0_i32_1 = arith.constant 0 : i32
    return %c0_i32, %c0_i32_0 : i32, i32
  }
  func.func @transform_11(%arg0: i32) -> (i32, i32) {
    %c0_i32 = arith.constant 0 : i32
    %c0_i32_0 = arith.constant 0 : i32
    return %c0_i32, %arg0 : i32, i32
  }
}

</mosaic_0001>

<bundles_post_ra>
// kernel: tpu_custom_call.1
= control target key start
LH: loop header
LB: loop body
LE: loop exit
PB: predicated region body
PF: predicated region fallthrough
CT: control target
= control target key end

     0   :  { %vm46_vm0 = vcmask 64512   ;;  %v2646_v0 = vmov 0.0   ;;  %vm2647_vm1 = vmmov 0   ;;  %v2648_v7 = vmov 0   ;;  %s2850_s0 = inlined_call_operand.vmem [shape: f32[8,2], index: 0, kind: input, shape index: {}]   ;;  %s2851_s1 = inlined_call_operand.vmem [shape: f32[8,8], index: 1, kind: input, shape index: {}]   ;;  %s2852_s2 = inlined_call_operand.vmem [shape: f32[8,1], index: 2, kind: input, shape index: {}]   ;;  %s2853_s4 = inlined_call_operand.vmem [shape: f32[16,1], index: 4, kind: input, shape index: {}]   ;;  %s2854_s8 = inlined_call_operand.vmem [shape: f32[4,1], index: 8, kind: input, shape index: {}]   ;;  %s2855_s3 = inlined_call_operand.vmem [shape: f32[16,8], index: 3, kind: input, shape index: {}]   ;;  %s2856_s6 = inlined_call_operand.vmem [shape: f32[8,1], index: 6, kind: input, shape index: {}]   ;;  %s2857_s10 = inlined_call_operand.vmem [shape: f32[4,1], index: 10, kind: input, shape index: {}]   ;;  %s2858_s5 = inlined_call_operand.vmem [shape: f32[8,16], index: 5, kind: input, shape index: {}]   ;;  %s2859_s7 = inlined_call_operand.vmem [shape: f32[4,8], index: 7, kind: input, shape index: {}]   ;;  %s2860_s9 = inlined_call_operand.vmem [shape: f32[4,4], index: 9, kind: input, shape index: {}]   ;;  %s2861_s11 = inlined_call_operand.vmem [shape: f32[4,2], index: 11, kind: output, shape index: {}]  }
   0x1   :  { %2479 = vmatprep.subr.mxu0 %v2646_v0  ;;  %2484 = vmatprep.subr.mxu1 %v2646_v0  ;;  %v38_v1 = vld [vmem:[%s2850_s0] sm:$0xff]  ;;  %v501_v10 = vld [vmem:[%s2853_s4 + $0x8] sm:$0xff]  ;;  %vm1018_vm2 = vcmask 130048   ;;  %vm1948_vm3 = vcmask 31744   ;;  %vm1952_vm4 = vcmask 1043456  }
   0x2   :  { %v39_v2 = vld [vmem:[%s2851_s1] sm:$0xff]  ;;  %v81_v4 = vand.u32 4294901760, %v38_v1  ;;  %2481 = vmatprep.mubr.msk.f32.mxu0 %vm2647_vm1, %v2646_v0  ;;  %2486 = vmatprep.mubr.msk.f32.mxu1 %vm2647_vm1, %v2646_v0  ;;  %v499_v28 = vld [vmem:[%s2855_s3 + $0x8] sm:$0xff] }
   0x3   :  { %v40_v3 = vld [vmem:[%s2852_s2] sm:$0xff]  ;;  %v48_v5 = vsel %vm46_vm0, %v39_v2, 0  ;;  %2644 = vset.pattern.permute.xlu0 %v2648_v7  ;;  %2645 = vset.pattern.permute.xlu1 %v2648_v7  ;;  %v516_v29 = vsel %vm46_vm0, %v499_v28, 0 }
   0x4   :  { %v116_v6 = vand.u32 4294901760, %v48_v5  ;;  %2480 = vmatpush3.msra.mxu0 %v81_v4  ;;  %v158_v8 = vsub.f32 %v38_v1, %v81_v4  ;;  %43 = vperm.xlu0 %2644, %v40_v3   ;;  %v1484_v15 = vld [vmem:[%s2854_s8] sm:$0xf]  ;;  %v594_v34 = vand.u32 4294901760, %v516_v29 }
   0x5   :  { %2489 = vmatprep.subr.mxu0 %v2646_v0  ;;  %v498_v18 = vld [vmem:[%s2855_s3] sm:$0xff] }
   0x6   :  { %v117_v9 = vsub.f32 %v48_v5, %v116_v6  ;;  %v159_v11 = vand.u32 4294901760, %v158_v8  ;;  %v513_v19 = vsel %vm46_vm0, %v498_v18, 0  ;;  %v500_v25 = vld [vmem:[%s2853_s4] sm:$0xff]  ;;  %v595_v41 = vsub.f32 %v516_v29, %v594_v34 }
   0x7   :  { %v2747_v20 = vand.u32 4294901760, %v513_v19  ;;  %504 = vperm.xlu1 %2645, %v500_v25   ;;  %v1012_v26 = vld [vmem:[%s2856_s6] sm:$0xff] }
   0x8   :  { %v118_v12 = vand.u32 4294901760, %v117_v9  ;;  %v160_v13 = vsub.f32 %v158_v8, %v159_v11  ;;  %509 = vperm.xlu0 %2644, %v501_v10   ;;  %v1942_v27 = vld [vmem:[%s2857_s10] sm:$0xf]  ;;  %v596_v48 = vand.u32 4294901760, %v595_v41 }
   0x9   :  { %v2750_v21 = vsub.f32 %v513_v19, %v2747_v20  ;;  %v1011_v63 = vld [vmem:[%s2858_s5] sm:$0xff] }
   0xa   :  { %v119_v14 = vsub.f32 %v117_v9, %v118_v12  ;;  %v161_v16 = vand.u32 4294901760, %v160_v13  ;;  %v597_v53 = vsub.f32 %v595_v41, %v596_v48  ;;  %v1020_v2 = vsel %vm1018_vm2, %v1011_v63, 0 }
   0xb   :  { %v586_v22 = vand.u32 4294901760, %v2750_v21  ;;  %1015 = vperm.xlu1 %2645, %v1012_v26  }
   0xc   :  { %v120_v17 = vand.u32 4294901760, %v119_v14  ;;  %2485 = vmatpush3.msra.mxu1 %v161_v16  ;;  %1487 = vperm.xlu0 %2644, %v1484_v15   ;;  %v598_v56 = vand.u32 4294901760, %v597_v53 }
   0xd   :  { %2487 = vmatmul.mubr.f32.vlgmr.msra.gmra.mxu1 %v116_v6  ;;  %2494 = vmatprep.subr.mxu1 %v2646_v0  ;;  %v587_v23 = vsub.f32 %v2750_v21, %v586_v22 }
   0xe   :  { %2482 = vmatmul.mubr.f32.vlgmr.msra.gmra.mxu0 %v120_v17  ;;  %2495 = vmatpush3.msra.mxu1 %v81_v4 }
   0xf   :  { %2490 = vmatpush3.msra.mxu0 %v158_v8  ;;  %2491 = vmatprep.mubr.msk.f32.mxu0 %vm2647_vm1, %v2646_v0  ;;  %v588_v24 = vand.u32 4294901760, %v587_v23  ;;  %v2780_v8 = vand.u32 4294901760, %v1020_v2 }
  0x10   :  { %2496 = vmatprep.mubr.msk.f32.mxu1 %vm2647_vm1, %v2646_v0  ;;  %2499 = vmatprep.subr.mxu0 %v2646_v0 }
  0x11   :  { %2497 = vmatmul.mubr.f32.vlgmr.msra.gmra.mxu1 %v118_v12  ;;  %2504 = vmatprep.subr.mxu1 %v2646_v0  ;;  %v1090_v16 = vsub.f32 %v1020_v2, %v2780_v8 }
  0x12   :  { %2492 = vmatmul.mubr.f32.vlgmr.msra.gmra.mxu0 %v117_v9  ;;  %2505 = vmatpush3.msra.mxu1 %v81_v4 }
  0x13   :  { %2500 = vmatpush3.msra.mxu0 %v159_v11  ;;  %2501 = vmatprep.mubr.msk.f32.mxu0 %vm2647_vm1, %v2646_v0 }
  0x14   :  { %2506 = vmatprep.mubr.msk.f32.mxu1 %vm2647_vm1, %v2646_v0  ;;  %1945 = vperm.xlu1 %2645, %v1942_v27  }
  0x15   :  { %2507 = vmatmul.mubr.f32.vlgmr.msra.gmra.mxu1 %v116_v6 }
  0x16   :  { %2502 = vmatmul.mubr.f32.vlgmr.msra.gmra.mxu0 %v116_v6  ;;  %2516 = vmatprep.mubr.f32.mxu1 %v2747_v20 }
  0x17   :  { %2511 = vmatprep.mubr.f32.mxu0 %v588_v24  ;;  %v1091_v24 = vand.u32 4294901760, %v1090_v16 }
  0x7f   :  { %v44_v30 = vpop.permute.xlu0 %43 }
  0x82   :  { %v505_v4 = vpop.permute.xlu1 %504 }
  0x83   :  { %v510_v3 = vpop.permute.xlu0 %509 }
  0xcd   :  { %v198_v32 = vpop.f32.mrf.mxu1 }
  0xce   :  { %v122_v31 = vpop.f32.mrf.mxu0 }
  0xcf   :  { %v123_v33 = vadd.f32 %v122_v31, %v44_v30  ;;  %v2488_v36 = vpop.f32.mrf.mxu1  ;;  %v1092_v30 = vsub.f32 %v1090_v16, %v1091_v24 }
  0xd0   :  { %v2483_v35 = vpop.f32.mrf.mxu0 }
  0xd1   :  { %v199_v37 = vadd.f32 %v198_v32, %v123_v33  ;;  %v346_v39 = vpop.f32.mrf.mxu1  ;;  %v1093_v35 = vand.u32 4294901760, %v1092_v30 }
  0xd2   :  { %v272_v38 = vpop.f32.mrf.mxu0 }
  0xd3   :  { %v273_v40 = vadd.f32 %v272_v38, %v199_v37  ;;  %v2498_v43 = vpop.f32.mrf.mxu1 }
  0xd4   :  { %v2493_v42 = vpop.f32.mrf.mxu0 }
  0xd5   :  { %v347_v44 = vadd.f32 %v346_v39, %v273_v40  ;;  %v492_v46 = vpop.f32.mrf.mxu1 }
  0xd6   :  { %v420_v45 = vpop.f32.mrf.mxu0 }
  0xd7   :  { %v421_v47 = vadd.f32 %v420_v45, %v347_v44  ;;  %v2508_v50 = vpop.f32.mrf.mxu1 }
  0xd8   :  { %v2503_v49 = vpop.f32.mrf.mxu0  ;;  %v1016_v50 = vpop.permute.xlu1 %1015 }
  0xd9   :  { %v493_v51 = vadd.f32 %v492_v46, %v421_v47  ;;  %v1483_v46 = vld [vmem:[%s2859_s7] sm:$0xf] }
  0xdb   :  { %v496_v52 = vmul.f32 0.01, %v493_v51 }
  0xdd   :  { %v497_v54 = vmax.f32 %v493_v51, %v496_v52 }
  0xdf   :  { %v549_v55 = vand.u32 4294901760, %v497_v54 }
  0xe1   :  { %v636_v57 = vsub.f32 %v497_v54, %v549_v55  ;;  %2509 = vmatprep.subr.mxu0 %v549_v55 }
  0xe2   :  { %2510 = vmatpush3.msra.mxu0 %v549_v55 }
  0xe3   :  { %2512 = vmatmul.mubr.f32.vlgmr.msra.gmra.mxu0 %v598_v56  ;;  %2519 = vmatprep.subr.mxu0 %v636_v57  ;;  %v637_v58 = vand.u32 4294901760, %v636_v57 }
  0xe4   :  { %2520 = vmatpush3.msra.mxu0 %v636_v57  ;;  %2521 = vmatprep.mubr.f32.mxu0 %v2750_v21 }
  0xe5   :  { %2529 = vmatprep.subr.mxu0 %v637_v58  ;;  %v638_v59 = vsub.f32 %v636_v57, %v637_v58 }
  0xe7   :  { %2522 = vmatmul.mubr.f32.vlgmr.msra.gmra.mxu0 %v595_v41  ;;  %v639_v60 = vand.u32 4294901760, %v638_v59 }
  0xe8   :  { %2530 = vmatpush3.msra.mxu0 %v637_v58  ;;  %2531 = vmatprep.mubr.f32.mxu0 %v2747_v20 }
  0xe9   :  { %2514 = vmatprep.subr.mxu1 %v639_v60  ;;  %2539 = vmatprep.subr.mxu0 %v2646_v0 }
  0xea   :  { %2515 = vmatpush3.msra.mxu1 %v639_v60 }
  0xeb   :  { %2517 = vmatmul.mubr.f32.vlgmr.msra.gmra.mxu1 %v594_v34  ;;  %2524 = vmatprep.subr.mxu1 %v549_v55 }
  0xec   :  { %2525 = vmatpush3.msra.mxu1 %v549_v55  ;;  %2526 = vmatprep.mubr.f32.mxu1 %v586_v22 }
  0xed   :  { %2534 = vmatprep.subr.mxu1 %v549_v55  ;;  %2532 = vmatmul.mubr.f32.vlgmr.msra.gmra.mxu0 %v594_v34 }
  0xee   :  { %2543 = vmatprep.mubr.msk.f32.mxu0 %vm2647_vm1, %v2646_v0 }
  0xef   :  { %2527 = vmatmul.mubr.f32.vlgmr.msra.gmra.mxu1 %v596_v48  ;;  %v1491_v48 = vsel %vm46_vm0, %v1483_v46, 0 }
  0xf0   :  { %2535 = vmatpush3.msra.mxu1 %v549_v55  ;;  %2536 = vmatprep.mubr.f32.mxu1 %v2747_v20  ;;  %v1559_v52 = vand.u32 4294901760, %v1491_v48 }
  0xf1   :  { %2546 = vmatprep.subr.mxu1 %v2646_v0 }
  0xf2   :  { %v1560_v57 = vsub.f32 %v1491_v48, %v1559_v52 }
  0xf3   :  { %2537 = vmatmul.mubr.f32.vlgmr.msra.gmra.mxu1 %v594_v34 }
  0xf4   :  { %2550 = vmatprep.mubr.msk.f32.mxu1 %vm2647_vm1, %v2646_v0 }
 0x1a3   :  { %v2513_v61 = vpop.f32.mrf.mxu0 }
 0x1a4   :  { %v601_v5 = vadd.f32 %v2513_v61, %v510_v3 }
 0x1a5   :  { %v590_v62 = vpop.f32.mrf.mxu0 }
 0x1a6   :  { %v591_v9 = vadd.f32 %v590_v62, %v505_v4 }
 0x1a7   :  { %v2523_v1 = vpop.f32.mrf.mxu0 }
 0x1a9   :  { %v756_v7 = vpop.f32.mrf.mxu0 }
 0x1ab   :  { %v2518_v6 = vpop.f32.mrf.mxu1 }
 0x1ac   :  { %v683_v10 = vadd.f32 %v2518_v6, %v601_v5 }
 0x1ad   :  { %v676_v11 = vpop.f32.mrf.mxu1  ;;  %v2533_v15 = vpop.f32.mrf.mxu0 }
 0x1ae   :  { %v764_v12 = vadd.f32 %v2523_v1, %v683_v10  ;;  %v677_v13 = vadd.f32 %v676_v11, %v591_v9  ;;  %v1561_v1 = vand.u32 4294901760, %v1560_v57 }
 0x1af   :  { %v2528_v14 = vpop.f32.mrf.mxu1  ;;  %v919_v22 = vpop.f32.mrf.mxu0 }
 0x1b0   :  { %v757_v17 = vadd.f32 %v756_v7, %v677_v13  ;;  %v846_v18 = vadd.f32 %v2528_v14, %v764_v12  ;;  %v1562_v6 = vsub.f32 %v1560_v57, %v1561_v1 }
 0x1b1   :  { %v837_v19 = vpop.f32.mrf.mxu1 }
 0x1b2   :  { %v926_v20 = vadd.f32 %v2533_v15, %v846_v18  ;;  %v838_v21 = vadd.f32 %v837_v19, %v757_v17  ;;  %v1563_v9 = vand.u32 4294901760, %v1562_v6 }
 0x1b3   :  { %v2538_v23 = vpop.f32.mrf.mxu1 }
 0x1b4   :  { %v920_v25 = vadd.f32 %v919_v22, %v838_v21  ;;  %v1004_v26 = vadd.f32 %v2538_v23, %v926_v20  ;;  %v1488_v20 = vpop.permute.xlu0 %1487 }
 0x1b5   :  { %v997_v27 = vpop.f32.mrf.mxu1 }
 0x1b6   :  { %v1008_v28 = vmul.f32 0.01, %v1004_v26  ;;  %v998_v29 = vadd.f32 %v997_v27, %v920_v25 }
 0x1b8   :  { %v1010_v31 = vmax.f32 %v1004_v26, %v1008_v28  ;;  %v1007_v32 = vmul.f32 0.01, %v998_v29 }
 0x1ba   :  { %v1051_v33 = vand.u32 4294901760, %v1010_v31  ;;  %v1009_v34 = vmax.f32 %v998_v29, %v1007_v32 }
 0x1bc   :  { %v1129_v36 = vsub.f32 %v1010_v31, %v1051_v33  ;;  %v1054_v37 = vand.u32 4294901760, %v1009_v34  ;;  %2540 = vmatpush3.msra.mxu0 %v1051_v33 }
 0x1bd   :  { %2541 = vmatprep.subr.mxu0 %v2646_v0 }
 0x1be   :  { %v1130_v38 = vand.u32 4294901760, %v1129_v36  ;;  %v1136_v39 = vsub.f32 %v1009_v34, %v1054_v37  ;;  %2542 = vmatpush3.msra.mxu0 %v1054_v37 }
 0x1bf   :  { %2544 = vmatmul.mubr.f32.vlgmr.msra.gmra.mxu0 %v1093_v35  ;;  %2553 = vmatprep.subr.mxu0 %v2646_v0 }
 0x1c0   :  { %v1137_v40 = vand.u32 4294901760, %v1136_v39  ;;  %2554 = vmatpush3.msra.mxu0 %v1129_v36  ;;  %2557 = vmatprep.mubr.msk.f32.mxu0 %vm2647_vm1, %v2646_v0  ;;  %v1131_v41 = vsub.f32 %v1129_v36, %v1130_v38 }
 0x1c1   :  { %2555 = vmatprep.subr.mxu0 %v2646_v0 }
 0x1c2   :  { %2556 = vmatpush3.msra.mxu0 %v1136_v39  ;;  %v1132_v42 = vand.u32 4294901760, %v1131_v41  ;;  %v1138_v43 = vsub.f32 %v1136_v39, %v1137_v40 }
 0x1c3   :  { %2567 = vmatprep.subr.mxu0 %v2646_v0  ;;  %2558 = vmatmul.mubr.f32.vlgmr.msra.gmra.mxu0 %v1090_v16  ;;  %v1941_v16 = vld [vmem:[%s2860_s9] sm:$0xf] }
 0x1c4   :  { %2547 = vmatpush3.msra.mxu1 %v1132_v42  ;;  %2568 = vmatpush3.msra.mxu0 %v1130_v38  ;;  %v1139_v44 = vand.u32 4294901760, %v1138_v43  ;;  %v1950_v19 = vsel %vm1948_vm3, %v1941_v16, 0 }
 0x1c5   :  { %2548 = vmatprep.subr.mxu1 %v2646_v0  ;;  %2569 = vmatprep.subr.mxu0 %v2646_v0  ;;  %v2022_v23 = vand.u32 4294901760, %v1950_v19 }
 0x1c6   :  { %2549 = vmatpush3.msra.mxu1 %v1139_v44  ;;  %2570 = vmatpush3.msra.mxu0 %v1137_v40 }
 0x1c7   :  { %2551 = vmatmul.mubr.f32.vlgmr.msra.gmra.mxu1 %v2780_v8  ;;  %2560 = vmatprep.subr.mxu1 %v2646_v0  ;;  %v2023_v29 = vsub.f32 %v1950_v19, %v2022_v23 }
 0x1c8   :  { %2561 = vmatpush3.msra.mxu1 %v1051_v33  ;;  %2564 = vmatprep.mubr.msk.f32.mxu1 %vm2647_vm1, %v2646_v0 }
 0x1c9   :  { %2562 = vmatprep.subr.mxu1 %v2646_v0  ;;  %2571 = vmatprep.mubr.msk.f32.mxu0 %vm2647_vm1, %v2646_v0  ;;  %v2024_v35 = vand.u32 4294901760, %v2023_v29 }
 0x1ca   :  { %2563 = vmatpush3.msra.mxu1 %v1054_v37  ;;  %2572 = vmatmul.mubr.f32.vlgmr.msra.gmra.mxu0 %v2780_v8 }
 0x1cb   :  { %2565 = vmatmul.mubr.f32.vlgmr.msra.gmra.mxu1 %v1091_v24  ;;  %2574 = vmatprep.subr.mxu1 %v2646_v0  ;;  %v2025_v40 = vsub.f32 %v2023_v29, %v2024_v35 }
 0x1cc   :  { %2575 = vmatpush3.msra.mxu1 %v1051_v33  ;;  %2578 = vmatprep.mubr.msk.f32.mxu1 %vm2647_vm1, %v2646_v0 }
 0x1cd   :  { %2576 = vmatprep.subr.mxu1 %v2646_v0  ;;  %2581 = vmatprep.subr.mxu0 %v2646_v0  ;;  %v2026_v43 = vand.u32 4294901760, %v2025_v40 }
 0x1ce   :  { %2577 = vmatpush3.msra.mxu1 %v1054_v37  ;;  %2583 = vmatprep.mubr.msk.f32.mxu0 %vm2647_vm1, %v2646_v0 }
 0x1cf   :  { %2579 = vmatmul.mubr.f32.vlgmr.msra.gmra.mxu1 %v2780_v8  ;;  %2586 = vmatprep.subr.mxu1 %v2646_v0 }
 0x1d0   :  { %2588 = vmatprep.mubr.msk.f32.mxu1 %vm2647_vm1, %v2646_v0 }
 0x27f   :  { %v1095_v45 = vpop.f32.mrf.mxu0 }
 0x280   :  { %v1096_v53 = vadd.f32 %v1095_v45, %v1016_v50 }
 0x281   :  { %v2545_v47 = vpop.f32.mrf.mxu0 }
 0x283   :  { %v1252_v49 = vpop.f32.mrf.mxu0 }
 0x285   :  { %v2559_v51 = vpop.f32.mrf.mxu0 }
 0x287   :  { %v1176_v54 = vpop.f32.mrf.mxu1 }
 0x288   :  { %v1177_v55 = vadd.f32 %v1176_v54, %v1096_v53 }
 0x289   :  { %v2552_v56 = vpop.f32.mrf.mxu1 }
 0x28a   :  { %v1253_v58 = vadd.f32 %v1252_v49, %v1177_v55  ;;  %v1404_v59 = vpop.f32.mrf.mxu0 }
 0x28b   :  { %v1327_v60 = vpop.f32.mrf.mxu1 }
 0x28c   :  { %v1328_v61 = vadd.f32 %v1327_v60, %v1253_v58  ;;  %v2573_v62 = vpop.f32.mrf.mxu0 }
 0x28d   :  { %v2566_v63 = vpop.f32.mrf.mxu1 }
 0x28e   :  { %v1405_v2 = vadd.f32 %v1404_v59, %v1328_v61 }
 0x28f   :  { %v1477_v3 = vpop.f32.mrf.mxu1 }
 0x290   :  { %v1478_v4 = vadd.f32 %v1477_v3, %v1405_v2 }
 0x291   :  { %v2580_v5 = vpop.f32.mrf.mxu1 }
 0x292   :  { %v1481_v7 = vmul.f32 0.01, %v1478_v4 }
 0x294   :  { %v1482_v8 = vmax.f32 %v1478_v4, %v1481_v7 }
 0x296   :  { %v1524_v10 = vand.u32 4294901760, %v1482_v8 }
 0x298   :  { %v1601_v11 = vsub.f32 %v1482_v8, %v1524_v10  ;;  %2582 = vmatpush3.msra.mxu0 %v1524_v10 }
 0x299   :  { %2584 = vmatmul.mubr.f32.vlgmr.msra.gmra.mxu0 %v1563_v9  ;;  %2591 = vmatprep.subr.mxu0 %v2646_v0 }
 0x29a   :  { %2592 = vmatpush3.msra.mxu0 %v1601_v11  ;;  %2593 = vmatprep.mubr.msk.f32.mxu0 %vm2647_vm1, %v2646_v0  ;;  %v1602_v12 = vand.u32 4294901760, %v1601_v11 }
 0x29b   :  { %2601 = vmatprep.subr.mxu0 %v2646_v0 }
 0x29c   :  { %v1603_v13 = vsub.f32 %v1601_v11, %v1602_v12 }
 0x29d   :  { %2594 = vmatmul.mubr.f32.vlgmr.msra.gmra.mxu0 %v1560_v57 }
 0x29e   :  { %2602 = vmatpush3.msra.mxu0 %v1602_v12  ;;  %v1604_v14 = vand.u32 4294901760, %v1603_v13  ;;  %2603 = vmatprep.mubr.msk.f32.mxu0 %vm2647_vm1, %v2646_v0 }
 0x29f   :  { %2611 = vmatprep.subr.mxu0 %v2646_v0 }
 0x2a0   :  { %2587 = vmatpush3.msra.mxu1 %v1604_v14 }
 0x2a1   :  { %2589 = vmatmul.mubr.f32.vlgmr.msra.gmra.mxu1 %v1559_v52  ;;  %2596 = vmatprep.subr.mxu1 %v2646_v0 }
 0x2a2   :  { %2597 = vmatpush3.msra.mxu1 %v1524_v10  ;;  %2598 = vmatprep.mubr.msk.f32.mxu1 %vm2647_vm1, %v2646_v0 }
 0x2a3   :  { %2606 = vmatprep.subr.mxu1 %v2646_v0  ;;  %2604 = vmatmul.mubr.f32.vlgmr.msra.gmra.mxu0 %v1559_v52 }
 0x2a4   :  { %2613 = vmatprep.mubr.msk.f32.mxu0 %vm2647_vm1, %v2646_v0 }
 0x2a5   :  { %2599 = vmatmul.mubr.f32.vlgmr.msra.gmra.mxu1 %v1561_v1 }
 0x2a6   :  { %2607 = vmatpush3.msra.mxu1 %v1524_v10  ;;  %2608 = vmatprep.mubr.msk.f32.mxu1 %vm2647_vm1, %v2646_v0 }
 0x2a7   :  { %2616 = vmatprep.subr.mxu1 %v2646_v0 }
 0x2a9   :  { %2609 = vmatmul.mubr.f32.vlgmr.msra.gmra.mxu1 %v1559_v52  ;;  %v1946_v52 = vpop.permute.xlu1 %1945 }
 0x2aa   :  { %2618 = vmatprep.mubr.msk.f32.mxu1 %vm2647_vm1, %v2646_v0 }
 0x359   :  { %v1565_v15 = vpop.f32.mrf.mxu0 }
 0x35a   :  { %v1566_v22 = vadd.f32 %v1565_v15, %v1488_v20 }
 0x35b   :  { %v2585_v17 = vpop.f32.mrf.mxu0 }
 0x35d   :  { %v1715_v18 = vpop.f32.mrf.mxu0 }
 0x35f   :  { %v2595_v21 = vpop.f32.mrf.mxu0 }
 0x361   :  { %v1641_v24 = vpop.f32.mrf.mxu1 }
 0x362   :  { %v1642_v25 = vadd.f32 %v1641_v24, %v1566_v22 }
 0x363   :  { %v2590_v26 = vpop.f32.mrf.mxu1  ;;  %v1863_v27 = vpop.f32.mrf.mxu0 }
 0x364   :  { %v1716_v28 = vadd.f32 %v1715_v18, %v1642_v25 }
 0x365   :  { %v1789_v30 = vpop.f32.mrf.mxu1  ;;  %v2605_v31 = vpop.f32.mrf.mxu0 }
 0x366   :  { %v1790_v32 = vadd.f32 %v1789_v30, %v1716_v28 }
 0x367   :  { %v2600_v33 = vpop.f32.mrf.mxu1 }
 0x368   :  { %v1864_v34 = vadd.f32 %v1863_v27, %v1790_v32 }
 0x369   :  { %v1935_v36 = vpop.f32.mrf.mxu1 }
 0x36a   :  { %v1936_v37 = vadd.f32 %v1935_v36, %v1864_v34 }
 0x36b   :  { %v2610_v38 = vpop.f32.mrf.mxu1 }
 0x36c   :  { %v1939_v39 = vmul.f32 0.01, %v1936_v37 }
 0x36e   :  { %v1940_v41 = vmax.f32 %v1936_v37, %v1939_v39 }
 0x370   :  { %v1954_v42 = vsel %vm1952_vm4, %v1940_v41, 0 }
 0x371   :  { %v1987_v44 = vand.u32 4294901760, %v1954_v42 }
 0x373   :  { %v2064_v45 = vsub.f32 %v1954_v42, %v1987_v44  ;;  %2612 = vmatpush3.msra.mxu0 %v1987_v44 }
 0x374   :  { %2614 = vmatmul.mubr.f32.vlgmr.msra.gmra.mxu0 %v2026_v43  ;;  %2621 = vmatprep.subr.mxu0 %v2646_v0 }
 0x375   :  { %2622 = vmatpush3.msra.mxu0 %v2064_v45  ;;  %2623 = vmatprep.mubr.msk.f32.mxu0 %vm2647_vm1, %v2646_v0  ;;  %v2065_v46 = vand.u32 4294901760, %v2064_v45 }
 0x376   :  { %2631 = vmatprep.subr.mxu0 %v2646_v0 }
 0x377   :  { %v2066_v47 = vsub.f32 %v2064_v45, %v2065_v46 }
 0x378   :  { %2624 = vmatmul.mubr.f32.vlgmr.msra.gmra.mxu0 %v2023_v29 }
 0x379   :  { %2632 = vmatpush3.msra.mxu0 %v2065_v46  ;;  %v2067_v48 = vand.u32 4294901760, %v2066_v47  ;;  %2633 = vmatprep.mubr.msk.f32.mxu0 %vm2647_vm1, %v2646_v0 }
 0x37b   :  { %2617 = vmatpush3.msra.mxu1 %v2067_v48 }
 0x37c   :  { %2619 = vmatmul.mubr.f32.vlgmr.msra.gmra.mxu1 %v2022_v23  ;;  %2626 = vmatprep.subr.mxu1 %v2646_v0 }
 0x37d   :  { %2627 = vmatpush3.msra.mxu1 %v1987_v44  ;;  %2628 = vmatprep.mubr.msk.f32.mxu1 %vm2647_vm1, %v2646_v0 }
 0x37e   :  { %2636 = vmatprep.subr.mxu1 %v2646_v0  ;;  %2634 = vmatmul.mubr.f32.vlgmr.msra.gmra.mxu0 %v2022_v23 }
 0x380   :  { %2629 = vmatmul.mubr.f32.vlgmr.msra.gmra.mxu1 %v2024_v35 }
 0x381   :  { %2637 = vmatpush3.msra.mxu1 %v1987_v44  ;;  %2638 = vmatprep.mubr.msk.f32.mxu1 %vm2647_vm1, %v2646_v0 }
 0x384   :  { %2639 = vmatmul.mubr.f32.vlgmr.msra.gmra.mxu1 %v2022_v23 }
 0x434   :  { %v2028_v49 = vpop.f32.mrf.mxu0 }
 0x435   :  { %v2029_v54 = vadd.f32 %v2028_v49, %v1946_v52 }
 0x436   :  { %v2615_v50 = vpop.f32.mrf.mxu0 }
 0x438   :  { %v2178_v51 = vpop.f32.mrf.mxu0 }
 0x43a   :  { %v2625_v53 = vpop.f32.mrf.mxu0 }
 0x43c   :  { %v2104_v55 = vpop.f32.mrf.mxu1 }
 0x43d   :  { %v2105_v56 = vadd.f32 %v2104_v55, %v2029_v54 }
 0x43e   :  { %v2620_v57 = vpop.f32.mrf.mxu1  ;;  %v2326_v58 = vpop.f32.mrf.mxu0 }
 0x43f   :  { %v2179_v59 = vadd.f32 %v2178_v51, %v2105_v56 }
 0x440   :  { %v2252_v60 = vpop.f32.mrf.mxu1  ;;  %v2635_v61 = vpop.f32.mrf.mxu0 }
 0x441   :  { %v2253_v62 = vadd.f32 %v2252_v60, %v2179_v59 }
 0x442   :  { %v2630_v63 = vpop.f32.mrf.mxu1 }
 0x443   :  { %v2327_v1 = vadd.f32 %v2326_v58, %v2253_v62 }
 0x444   :  { %v2398_v2 = vpop.f32.mrf.mxu1 }
 0x445   :  { %v2399_v3 = vadd.f32 %v2398_v2, %v2327_v1 }
 0x446   :  { %v2640_v0 = vpop.f32.mrf.mxu1 }
 0x447   :  { %2402 = vst [vmem:[%s2861_s11] sm:$0xf] %v2399_v3 }

</bundles_post_ra>
